<compile_context>
chip_gen: v7x
topology: tpu7x:2x2x1
jax: 0.10.0
libtpu: 0.0.40
codegen_flags: <defaults>
</compile_context>

<pallas_src>
import math

import jax
import jax.numpy as jnp
from jax.experimental import pallas as pl
from jax.experimental.pallas import tpu as pltpu

D_MODEL = 32
D_FF = 64


def _round_up(n, m):
    return ((n + m - 1) // m) * m


def ffn_kernel(x_ref, w1_ref, b1_ref, w2_ref, b2_ref, o_ref):
    x = x_ref[...]                                             # (Rb, d_model) f32
    h = jnp.dot(x.astype(w1_ref.dtype), w1_ref[...],
                preferred_element_type=jnp.float32) + b1_ref[...]
    h = jnp.maximum(h, 0.0)                                    # ReLU (f32, VPU)
    y = jnp.dot(h.astype(w2_ref.dtype), w2_ref[...],
                preferred_element_type=jnp.float32) + b2_ref[...]
    o_ref[...] = y.astype(o_ref.dtype)                         # one block store


def feed_forward_block(x, w1, b1, w2, b2, *, block_rows=256, use_bf16=True):
    """x: (..., d_model).  w1: (d_model, d_ff), b1: (d_ff,), w2: (d_ff, d_model),
    b2: (d_model,).  Weights are stored transposed w.r.t. torch.nn.Linear, i.e.
    y = x @ w + b (same math as linear(x) with w = weight.T)."""
    orig_shape = x.shape
    d_model = orig_shape[-1]
    d_ff = w1.shape[-1]
    rows = math.prod(orig_shape[:-1])
    x2 = x.reshape(rows, d_model).astype(jnp.float32)

    # Row block: multiple of 8 (sublane fill), as large as block_rows, but keep
    # >= 2 grid steps when there is enough work so both v7x TCs stay busy.
    rp = _round_up(rows, 8)
    rb = min(block_rows, rp)
    if rp // rb < 2 and rp >= 16:
        rb = _round_up(pl.cdiv(rp, 2), 8)
    rp = _round_up(rp, rb)
    if rp != rows:
        x2 = jnp.pad(x2, ((0, rp - rows), (0, 0)))
    grid = (rp // rb,)

    wdt = jnp.bfloat16 if use_bf16 else jnp.float32
    w1c = w1.astype(wdt)
    w2c = w2.astype(wdt)
    b1c = b1.reshape(1, d_ff).astype(jnp.float32)
    b2c = b2.reshape(1, d_model).astype(jnp.float32)

    cost = pl.CostEstimate(
        flops=4 * rp * d_model * d_ff,
        transcendentals=0,
        bytes_accessed=(x2.size + rp * d_model) * 4
        + w1c.size * w1c.dtype.itemsize + w2c.size * w2c.dtype.itemsize
        + (b1c.size + b2c.size) * 4,
    )

    out = pl.pallas_call(
        ffn_kernel,
        out_shape=jax.ShapeDtypeStruct((rp, d_model), x.dtype),
        grid=grid,
        in_specs=[
            pl.BlockSpec((rb, d_model), lambda i: (i, 0)),   # x rows (streamed)
            pl.BlockSpec((d_model, d_ff), lambda i: (0, 0)),  # w1 (resident)
            pl.BlockSpec((1, d_ff), lambda i: (0, 0)),        # b1
            pl.BlockSpec((d_ff, d_model), lambda i: (0, 0)),  # w2
            pl.BlockSpec((1, d_model), lambda i: (0, 0)),     # b2
        ],
        out_specs=pl.BlockSpec((rb, d_model), lambda i: (i, 0)),
        compiler_params=pltpu.CompilerParams(
            dimension_semantics=("parallel",)),
        cost_estimate=cost,
    )(x2, w1c, b1c, w2c, b2c)

    return out[:rows].reshape(orig_shape)


def ref_feed_forward(x, w1, b1, w2, b2):
    """Pure-JAX reference mirroring the PyTorch forward (f32 throughout)."""
    h = jnp.maximum(x @ w1 + b1, 0.0)
    return h @ w2 + b2


if __name__ == "__main__":
    B, S = 2, 8
    key = jax.random.PRNGKey(0)
    keys = jax.random.split(key, 6)

    x = jax.random.normal(keys[0], (B, S, D_MODEL), jnp.float32)

    def init(k, shape, scale=0.1):
        return scale * jax.random.normal(k, shape, jnp.float32)

    w1 = init(keys[1], (D_MODEL, D_FF))
    b1 = init(keys[2], (D_FF,))
    w2 = init(keys[3], (D_FF, D_MODEL))
    b2 = init(keys[4], (D_MODEL,))

    ref = ref_feed_forward(x, w1, b1, w2, b2)

    # Default path: bf16 MXU inputs, f32 accumulation / epilogue.
    out = feed_forward_block(x, w1, b1, w2, b2)
    out = jax.block_until_ready(out)
    assert out.shape == (B, S, D_MODEL)
    assert jnp.allclose(out, ref, atol=2e-2, rtol=2e-2), "bf16 kernel mismatch"

    # Full-f32 path: tight tolerance check.
    out_f32 = feed_forward_block(x, w1, b1, w2, b2, use_bf16=False)
    out_f32 = jax.block_until_ready(out_f32)
    assert jnp.allclose(out_f32, ref, atol=1e-5, rtol=1e-5), "f32 kernel mismatch"

    # Odd leading shape (rows not a multiple of the block): exercises padding.
    x_odd = jax.random.normal(keys[5], (3, 5, D_MODEL), jnp.float32)
    out_odd = jax.block_until_ready(feed_forward_block(x_odd, w1, b1, w2, b2))
    ref_odd = ref_feed_forward(x_odd, w1, b1, w2, b2)
    assert out_odd.shape == x_odd.shape
    assert jnp.allclose(out_odd, ref_odd, atol=2e-2, rtol=2e-2), "padded-rows mismatch"

    print("KERNEL_OK")
</pallas_src>

<mosaic_0001>
module attributes {stable_mosaic.version = 11 : i64} {
  func.func @ffn_kernel(%arg0: i32, %arg1: memref<8x32xf32, #tpu.memory_space<vmem>>, %arg2: memref<32x64xbf16, #tpu.memory_space<vmem>>, %arg3: memref<1x64xf32, #tpu.memory_space<vmem>>, %arg4: memref<64x32xbf16, #tpu.memory_space<vmem>>, %arg5: memref<1x32xf32, #tpu.memory_space<vmem>>, %arg6: memref<8x32xf32, #tpu.memory_space<vmem>>) attributes {dimension_semantics = [#tpu.dimension_semantics<parallel>], iteration_bounds = array<i64: 2>, scalar_prefetch = 0 : i64, scratch_operands = 0 : i64, tpu.core_type = #tpu.core_type<tc>, window_params = [{transform_indices = @transform_0, window_bounds = array<i64: 8, 32>}, {pipeline_mode = #tpu.pipeline_mode<synchronous>, transform_indices = @transform_1, window_bounds = array<i64: 32, 64>}, {pipeline_mode = #tpu.pipeline_mode<synchronous>, transform_indices = @transform_2, window_bounds = array<i64: 1, 64>}, {pipeline_mode = #tpu.pipeline_mode<synchronous>, transform_indices = @transform_3, window_bounds = array<i64: 64, 32>}, {pipeline_mode = #tpu.pipeline_mode<synchronous>, transform_indices = @transform_4, window_bounds = array<i64: 1, 32>}, {transform_indices = @transform_5, window_bounds = array<i64: 8, 32>}]} {
    %c0 = arith.constant 0 : index
    %c0_0 = arith.constant 0 : index
    %0 = vector.load %arg1[%c0, %c0_0] : memref<8x32xf32, #tpu.memory_space<vmem>>, vector<8x32xf32>
    %1 = arith.truncf %0 : vector<8x32xf32> to vector<8x32xbf16>
    %c0_1 = arith.constant 0 : index
    %c0_2 = arith.constant 0 : index
    %2 = vector.load %arg2[%c0_1, %c0_2] : memref<32x64xbf16, #tpu.memory_space<vmem>>, vector<32x64xbf16>
    %cst = arith.constant dense<0.000000e+00> : vector<8x64xf32>
    %3 = tpu.matmul %1, %2, %cst {dimension_numbers = #tpu.dot_dimension_numbers<[1], [0], [0], [1], [0, 0, 1, 1], [], []>} : vector<8x32xbf16>, vector<32x64xbf16>, vector<8x64xf32> -> vector<8x64xf32>
    %c0_3 = arith.constant 0 : index
    %c0_4 = arith.constant 0 : index
    %4 = vector.load %arg3[%c0_3, %c0_4] : memref<1x64xf32, #tpu.memory_space<vmem>>, vector<1x64xf32>
    %5 = vector.broadcast %4 : vector<1x64xf32> to vector<8x64xf32>
    %6 = arith.addf %3, %5 : vector<8x64xf32>
    %cst_5 = arith.constant 0.000000e+00 : f32
    %7 = vector.broadcast %cst_5 : f32 to vector<8x64xf32>
    %8 = arith.maximumf %6, %7 : vector<8x64xf32>
    %9 = arith.truncf %8 : vector<8x64xf32> to vector<8x64xbf16>
    %c0_6 = arith.constant 0 : index
    %c0_7 = arith.constant 0 : index
    %10 = vector.load %arg4[%c0_6, %c0_7] : memref<64x32xbf16, #tpu.memory_space<vmem>>, vector<64x32xbf16>
    %cst_8 = arith.constant dense<0.000000e+00> : vector<8x32xf32>
    %11 = tpu.matmul %9, %10, %cst_8 {dimension_numbers = #tpu.dot_dimension_numbers<[1], [0], [0], [1], [0, 0, 1, 1], [], []>} : vector<8x64xbf16>, vector<64x32xbf16>, vector<8x32xf32> -> vector<8x32xf32>
    %c0_9 = arith.constant 0 : index
    %c0_10 = arith.constant 0 : index
    %12 = vector.load %arg5[%c0_9, %c0_10] : memref<1x32xf32, #tpu.memory_space<vmem>>, vector<1x32xf32>
    %13 = vector.broadcast %12 : vector<1x32xf32> to vector<8x32xf32>
    %14 = arith.addf %11, %13 : vector<8x32xf32>
    %c0_11 = arith.constant 0 : index
    %c0_12 = arith.constant 0 : index
    %15 = vector.load %arg6[%c0_11, %c0_12] : memref<8x32xf32, #tpu.memory_space<vmem>>, vector<8x32xf32>
    tpu.vector_store %arg6[%c0_11, %c0_12], %14 {strides = array<i32>} : memref<8x32xf32, #tpu.memory_space<vmem>>, vector<8x32xf32>,
    return
  }
  func.func @transform_0(%arg0: i32) -> (i32, i32) {
    %c0_i32 = arith.constant 0 : i32
    %c0_i32_0 = arith.constant 0 : i32
    return %arg0, %c0_i32 : i32, i32
  }
  func.func @transform_1(%arg0: i32) -> (i32, i32) {
    %c0_i32 = arith.constant 0 : i32
    %c0_i32_0 = arith.constant 0 : i32
    %c0_i32_1 = arith.constant 0 : i32
    return %c0_i32, %c0_i32_0 : i32, i32
  }
  func.func @transform_2(%arg0: i32) -> (i32, i32) {
    %c0_i32 = arith.constant 0 : i32
    %c0_i32_0 = arith.constant 0 : i32
    %c0_i32_1 = arith.constant 0 : i32
    return %c0_i32, %c0_i32_0 : i32, i32
  }
  func.func @transform_3(%arg0: i32) -> (i32, i32) {
    %c0_i32 = arith.constant 0 : i32
    %c0_i32_0 = arith.constant 0 : i32
    %c0_i32_1 = arith.constant 0 : i32
    return %c0_i32, %c0_i32_0 : i32, i32
  }
  func.func @transform_4(%arg0: i32) -> (i32, i32) {
    %c0_i32 = arith.constant 0 : i32
    %c0_i32_0 = arith.constant 0 : i32
    %c0_i32_1 = arith.constant 0 : i32
    return %c0_i32, %c0_i32_0 : i32, i32
  }
  func.func @transform_5(%arg0: i32) -> (i32, i32) {
    %c0_i32 = arith.constant 0 : i32
    %c0_i32_0 = arith.constant 0 : i32
    return %arg0, %c0_i32 : i32, i32
  }
}

</mosaic_0001>

<bundles_post_ra>
// kernel: tpu_custom_call.1
= control target key start
LH: loop header
LB: loop body
LE: loop exit
PB: predicated region body
PF: predicated region fallthrough
CT: control target
= control target key end

     0   :  { %10 = vsyncpa [#allocation3], 0  ;;  %s767_s0 = inlined_call_operand.vmem [shape: f32[16,32], index: 0, kind: input, shape index: {}]   ;;  %s768_s1 = inlined_call_operand.vmem [shape: bf16[32,64], index: 1, kind: input, shape index: {}]   ;;  %s769_s2 = inlined_call_operand.vmem [shape: f32[1,64], index: 2, kind: input, shape index: {}]   ;;  %s770_s3 = inlined_call_operand.vmem [shape: bf16[64,32], index: 3, kind: input, shape index: {}]   ;;  %s771_s4 = inlined_call_operand.vmem [shape: f32[1,32], index: 4, kind: input, shape index: {}]   ;;  %s772_s5 = inlined_call_operand.hbm [shape: f32[16,32], index: 5, kind: output, shape index: {}]  }
   0x1   :  { %12 = vsyncpa [#allocation3 + $0x1], 0  ;;  %s641_s18 = smov 0   ;;  %s643_s19 = smov 0  }
   0x2   :  { %s645_s20 = smov 0   ;;  %s647_s21 = smov 0  }
   0x3 LB: > { %s662_s22 = sadd.s32 4294967295, %s606_s21   ;;  %s449_s23 = sadd.s32 4294967294, %s606_s21   ;;  %s606_s21 = sphi %s647_s21, %s778_s21   ;;  %s602_s20 = sphi %s645_s20, %s777_s20   ;;  %s598_s19 = sphi %s643_s19, %s776_s19   ;;  %s594_s18 = sphi %s641_s18, %s775_s18  }
   0x4   : > { %s666_s24 = sadd.s32 1, %s606_s21   ;;  %s135_s25 = sadd.s32 1, %s602_s20 }
   0x5   : > { %s132_s26 = ssub.s32 %s606_s21, %s666_s24  ;;  %p145_p0 = scmp.ne.s32.totalorder %s602_s20, %s598_s19 }
   0x6   : > { %p133_p1 = scmp.eq.s32.totalorder %s132_s26, 0  ;;  %p146_p2 = scmp.eq.s32.totalorder %s662_s22, 1 }
   0x7   : > { %p151_p3 = scmp.ne.s32.totalorder %s598_s19, %s594_s18  ;;  %p152_p4 = scmp.eq.s32.totalorder %s449_s23, 1 }
   0x8   : > { %s677_s27 = scalar_select %p133_p1, %s602_s20, %s135_s25  }
   0x9   : > { %p679_p5 = por %p146_p2, %p145_p0  ;;  %p683_p6 = por %p152_p4, %p151_p3 }
   0xa   : > { %p452_p7 = scmp.ge.s32.totalorder %s606_s21, 1  ;;  %p189_p8 = scmp.lt.s32.totalorder %s606_s21, 3 }
   0xc   : > { %p190_p9 = pnand %p452_p7, %p189_p8 }
   0xd   : > { %v538_v0 = vld [vmem:[%s768_s1] sm:$0xff] (!%p190_p9)   ;;  %v608_v1 = vmov (!%p190_p9), 0.0   ;;  %v539_v2 = vld [vmem:[%s768_s1 + $0x8] sm:$0xff] (!%p190_p9)   ;;  %vm609_vm0 = vmmov (!%p190_p9), 0   ;;  %p216_p10 = scmp.lt.s32.totalorder (!%p190_p9), %s662_s22, 1  ;;  %vm246_vm1 = vcmask (!%p190_p9), 261120  }
   0xe   : > { %193 = sbr.rel (%p190_p9) target bundleno = 474 (0x1da), region = 40  ;;  %477 = vmatprep.subr.bf16.mxu0 (!%p190_p9), %v608_v1  ;;  %485 = vmatprep.subr.bf16.mxu1 (!%p190_p9), %v608_v1  ;;  %v540_v3 = vld [vmem:[%s770_s3] sm:$0xff] (!%p190_p9)   ;;  %v541_v4 = vld [vmem:[%s770_s3 + $0x8] sm:$0xff] (!%p190_p9)   ;;  %v542_v7 = vld [vmem:[%s770_s3 + $0x10] sm:$0xff] (!%p190_p9)   ;;  %vm331_vm2 = vcmask (!%p190_p9), 523264   ;;  %s213_s8 = sand.u32 (!%p190_p9), 1, %s598_s19  }
   0xf   : > { %478 = vmatpush3.bf16.msra.mxu0 (!%p190_p9), %v538_v0  ;;  %481 = vmatprep.mubr.msk.bf16.mxu0 (!%p190_p9), %vm609_vm0, %v608_v1  ;;  %v543_v8 = vld [vmem:[%s770_s3 + $0x18] sm:$0xff] (!%p190_p9)   ;;  %v455_v9 = vld [vmem:[%s769_s2] ss:$0 sm:$0xff] (!%p190_p9)  ;;  %s453_s9 = sshll.u32 (!%p190_p9), %s213_s8, 3  ;;  %s466_s12 = sshll.u32 (!%p190_p9), %s662_s22, 7 }
  0x10   : > { %479 = vmatprep.subr.bf16.mxu0 (!%p190_p9), %v608_v1  ;;  %493 = vmatprep.mubr.msk.bf16.mxu1 (!%p190_p9), %vm609_vm0, %v608_v1  ;;  %v459_v17 = vld [vmem:[%s771_s4] ss:$0 sm:$0xff] (!%p190_p9)  ;;  %s215_s13 = scalar_lea.vmem (!%p190_p9), [#allocation2], %s453_s9  ;;  %s610_s25 = smov (!%p190_p9), [#allocation2]  }
  0x11   : > { %486 = vmatpush3.bf16.msra.mxu1 (!%p190_p9), %v540_v3  ;;  %s548_s26 = sshll.u32 (!%p190_p9), %s610_s25, 4  ;;  %s549_s26 = int_to_ptr.vmem [resolvable:$false] %s548_s26 }
  0x12   : > { %487 = vmatprep.subr.bf16.mxu1 (!%p190_p9), %v608_v1  ;;  %s550_s30 = scalar_lea.vmem (!%p190_p9), %s549_s26, 256 }
  0x13   : > { %480 = vmatpush3.bf16.msra.mxu0 (!%p190_p9), %v539_v2 }
  0x15   : > { %s217_s11 = scalar_select %p216_p10, %s662_s22, 1  ;;  %488 = vmatpush3.bf16.msra.mxu1 %v541_v4 }
  0x16   : > { %489 = vmatprep.subr.bf16.mxu1 %v608_v1  ;;  %s377_s22 = scalar_lea.sflag [#allocation3], %s213_s8 }
  0x17   : > { %s454_s14 = sshll.u32 %s217_s11, 3 }
  0x18   : > { %s219_s17 = scalar_lea.vmem %s767_s0, %s454_s14  ;;  %s390_s14 = sshll.u32 %s215_s13, 4  ;;  %s726_s14 = int_to_ptr.vmem [resolvable:$true] %s390_s14 }
  0x19   : > { %v221_v5 = vld [vmem:[%s219_s17] sm:$0xff]  ;;  %490 = vmatpush3.bf16.msra.mxu1 %v542_v7  ;;  %s724_s17 = scalar_lea.hbm %s772_s5, %s466_s12  ;;  %s544_s23 = scalar_lea.vmem %s726_s14, 128 }
  0x1a   : > { %v222_v6 = vpack.c.bf16 %v221_v5, %v221_v5  ;;  %491 = vmatprep.subr.bf16.mxu1 %v608_v1  ;;  %p545_p11 = scmp.ne.s32.totalorder %s726_s14, %s544_s23  ;;  %p551_p0 = scmp.lt.s32.totalorder %s726_s14, %s549_s26 }
  0x1b   : > { %p552_p1 = scmp.lt.s32.totalorder %s550_s30, %s544_s23 }
  0x1c   : > { %482 = vmatmul.mubr.msk.bf16.vlgmr.msra.gmra.mrb[0].mxu0 %vm246_vm1, %v222_v6  ;;  %p546_p12 = pnand %p545_p11, %p679_p5 }
  0x1d   : > { %492 = vmatpush3.bf16.msra.mxu1 %v543_v8  ;;  %p553_p2 = por %p552_p1, %p551_p0 }
  0x1e   : > { %p547_p13 = pneg %p546_p12 }
  0x20   : > { %p554_p3 = pnand %p553_p2, %p547_p13 }
  0xef   : > { %v284_v10 = vpop.f32.mrb[0].mxu0 }
  0xf0   : > { %v285_v11 = vadd.f32 %v455_v9, %v284_v10  ;;  %v483_v12 = vpop.f32.mrb[1].mxu0 }
  0xf1   : > { %v287_v13 = vpop.f32.mrb[2].mxu0 }
  0xf2   : > { %v290_v14 = vmax.f32 %v285_v11, 0.0  ;;  %v484_v15 = vpop.f32.mrb[3].mxu0 }
  0xf4   : > { %v291_v16 = vpack.c.bf16 %v290_v14, %v290_v14 }
  0xf6   : > { %494 = vmatmul.mubr.msk.bf16.vlgmr.msra.gmra.mrb[0].mxu1 %vm331_vm2, %v291_v16 }
 0x1c9   : > { %v369_v18 = vpop.f32.mrb[0].mxu1 }
 0x1ca   : > { %v370_v19 = vadd.f32 %v459_v17, %v369_v18  ;;  %v495_v20 = vpop.f32.mrb[1].mxu1 }
 0x1cb   : > { %v372_v21 = vpop.f32.mrb[2].mxu1 }
 0x1cc   : > { %v496_v22 = vpop.f32.mrb[3].mxu1  ;;  %375 = vst.msk [vmem:[%s215_s13] sm:$0xff] %vm246_vm1, %v370_v19 }
 0x1cd   : > { %557 = shalt.err (!%p554_p3)
}
 0x1ce   : > { %s558_s6 = scalar_lea.hbm %s724_s17, 128  ;;  %s562_s9 = scalar_lea.hbm %s772_s5, 256 }
 0x1cf   : > { %p559_p4 = scmp.ne.s32.totalorder %s724_s17, %s558_s6  ;;  %p563_p9 = scmp.lt.u32.totalorder %s724_s17, %s772_s5 }
 0x1d0   : > { %p564_p10 = scmp.lt.u32.totalorder %s562_s9, %s558_s6  ;;  %p566_p12 = scmp.lt.u32.totalorder %s558_s6, %s724_s17 }
 0x1d1   : > { %p560_p7 = pnand %p559_p4, %p679_p5 }
 0x1d2   : > { %p565_p11 = por %p564_p10, %p563_p9 }
 0x1d3   : > { %p561_p8 = pneg %p560_p7 }
 0x1d4   : > { %p567_p13 = por %p566_p12, %p565_p11 }
 0x1d6   : > { %p568_p0 = pnand %p567_p13, %p561_p8 }
 0x1d8   : > { %571 = shalt.err (!%p568_p0)
}
 0x1d9   : > { %497 = dma.vmem_to_hbm [thread:$0]  (%p679_p5), %s726_s14, 128, %s724_s17, %s377_s22  }
 0x1da PF: > { %p503_p1 = scmp.ge.s32.totalorder %s606_s21, 2  ;;  %s402_s12 = sand.u32 1, %s594_s18  }
 0x1db   : > { %s403_s13 = scalar_lea.sflag [#allocation3], %s402_s12 }
 0x1dc   : > { %p500_p2 = pnand %p503_p1, %p683_p6 }
 0x1de   : > { %589 = dma.done.wait (!%p500_p2), %s403_s13, 128  }
 0x1df   : > { %591 = vsyncadd (!%p500_p2), %s403_s13, 4294967168  ;;  %p15_p3 = scmp.ge.s32.totalorder %s666_s24, 4   ;;  %s775_s18 = smov %s598_s19 }
 0x1e0   : > { %s776_s19 = smov %s602_s20  ;;  %s777_s20 = smov %s677_s27 }
 0x1e1   : > { %s778_s21 = smov %s666_s24  ;;  %17 = sbr.rel (!%p15_p3) target bundleno = 3 (0x3), region = 75 }
 0x1e8   :  { %408 = vsyncpa [#allocation3], 1 }
 0x1e9   :  { %410 = vsyncpa [#allocation3 + $0x1], 1 }

</bundles_post_ra>
